<compile_context>
chip_gen: v7x
topology: tpu7x:2x2x1
jax: 0.10.0
libtpu: 0.0.40
codegen_flags: <defaults>
</compile_context>

<pallas_src>
import jax
import jax.numpy as jnp
from jax.experimental import pallas as pl
from jax.experimental.pallas import tpu as pltpu


def _round_up(x, m):
    return ((x + m - 1) // m) * m


def _cdiv(a, b):
    return -(-a // b)


# ---------------------------------------------------------------------------
# Kernel
# ---------------------------------------------------------------------------
def policy_net_kernel(x_ref, w1_ref, b1_ref, w2_ref, b2_ref, w3_ref, b3_ref,
                      out_ref):
    cdt = w1_ref.dtype
    # Cast x to the matmul operand dtype in-kernel (VALU has slack here; avoids
    # a separate wrapper-side convert op and keeps x HBM traffic at 4 B/elem).
    x = x_ref[...].astype(cdt)

    # fc1 + ReLU (MXU matmul, f32 accumulation)
    h1 = jnp.dot(x, w1_ref[...], preferred_element_type=jnp.float32)
    h1 = jnp.maximum(h1 + b1_ref[...], 0.0).astype(cdt)
    # fc2 + ReLU
    h2 = jnp.dot(h1, w2_ref[...], preferred_element_type=jnp.float32)
    h2 = jnp.maximum(h2 + b2_ref[...], 0.0).astype(cdt)
    # fc3
    logits = jnp.dot(h2, w3_ref[...], preferred_element_type=jnp.float32)
    logits = logits + b3_ref[...]

    # softmax over dim=1 (action axis), numerically stable, exact normalization
    m = jnp.max(logits, axis=1, keepdims=True)
    e = jnp.exp(logits - m)
    probs = e / jnp.sum(e, axis=1, keepdims=True)

    # Lane-dense store: (tile, A) -> (tile//pack, pack*A) row-major relayout
    # (lands on the otherwise-idle XLU / a VMEM copy; makes the store path and
    # writeback DMA dense).  No-op when pack == 1.
    if probs.shape != out_ref.shape:
        probs = probs.reshape(out_ref.shape)
    out_ref[...] = probs.astype(out_ref.dtype)


# ---------------------------------------------------------------------------
# One-time capability probe for the lane-dense relayout
# ---------------------------------------------------------------------------
_LANE_PACK_SUPPORTED = None


def _lane_pack_supported():
    """Checks once (eagerly, tiny shapes) that an in-kernel
    (rows, A) -> (rows//8, 8*A) reshape lowers on this toolchain."""
    global _LANE_PACK_SUPPORTED
    if _LANE_PACK_SUPPORTED is None:
        def probe(x_ref, o_ref):
            p = jnp.exp(x_ref[...])
            p = p / jnp.sum(p, axis=1, keepdims=True)
            o_ref[...] = p.reshape(o_ref.shape)

        try:
            r = pl.pallas_call(
                probe, out_shape=jax.ShapeDtypeStruct((8, 128), jnp.float32)
            )(jnp.ones((64, 16), jnp.float32))
            jax.block_until_ready(r)
            _LANE_PACK_SUPPORTED = True
        except Exception:
            _LANE_PACK_SUPPORTED = False
    return _LANE_PACK_SUPPORTED


# ---------------------------------------------------------------------------
# Tiling: tail-aware, 8-aligned, >=2 grid steps for v7x's two TensorCores
# ---------------------------------------------------------------------------
def _choose_tiling(batch, row_align, max_tile, min_steps):
    n_steps = max(1, _cdiv(batch, max_tile))
    # Prefer >= min_steps grid steps when the batch is big enough to split, so
    # the "parallel" axis feeds both v7x TensorCores (free on v5e/v6e).
    if n_steps < min_steps and batch > row_align:
        n_steps = min_steps
    # Keep the step count even when more than min_steps are needed.
    if n_steps > min_steps and n_steps % 2:
        n_steps += 1
    tile = _round_up(_cdiv(batch, n_steps), row_align)
    return tile, n_steps, tile * n_steps


# ---------------------------------------------------------------------------
# Params
# ---------------------------------------------------------------------------
def _cast(a, dt):
    return a if a.dtype == dt else a.astype(dt)


def prepare_params(params, compute_dtype=jnp.bfloat16):
    """Pre-cast weights once (outside the per-step RL hot path)."""
    return {
        "w1": params["w1"].astype(compute_dtype),
        "w2": params["w2"].astype(compute_dtype),
        "w3": params["w3"].astype(compute_dtype),
        "b1": params["b1"].astype(jnp.float32).reshape(1, -1),
        "b2": params["b2"].astype(jnp.float32).reshape(1, -1),
        "b3": params["b3"].astype(jnp.float32).reshape(1, -1),
    }


def init_params(key, state_dim, hidden_dim, action_dim):
    """Deterministic init mimicking torch.nn.Linear's U(-1/sqrt(in), 1/sqrt(in))."""
    ks = jax.random.split(key, 6)

    def linear(kw, kb, fan_in, fan_out):
        bound = 1.0 / jnp.sqrt(float(fan_in))
        w = jax.random.uniform(kw, (fan_in, fan_out), jnp.float32, -bound, bound)
        b = jax.random.uniform(kb, (1, fan_out), jnp.float32, -bound, bound)
        return w, b

    w1, b1 = linear(ks[0], ks[1], state_dim, hidden_dim)
    w2, b2 = linear(ks[2], ks[3], hidden_dim, hidden_dim)
    w3, b3 = linear(ks[4], ks[5], hidden_dim, action_dim)
    return {"w1": w1, "b1": b1, "w2": w2, "b2": b2, "w3": w3, "b3": b3}


# ---------------------------------------------------------------------------
# Forward wrapper
# ---------------------------------------------------------------------------
def policy_net_forward(x, params, *, compute_dtype=jnp.bfloat16,
                       max_batch_tile=4096, min_grid_steps=2):
    """x: [B, state_dim] float32.  params: dict w1,b1,w2,b2,w3,b3 with [in,out]
    weights (prefer prepare_params() output to avoid per-call casts)."""
    B, state_dim = x.shape
    hidden_dim = params["w1"].shape[1]
    action_dim = params["w3"].shape[1]

    w1 = _cast(params["w1"], compute_dtype)
    w2 = _cast(params["w2"], compute_dtype)
    w3 = _cast(params["w3"], compute_dtype)
    b1 = _cast(params["b1"], jnp.float32).reshape(1, hidden_dim)
    b2 = _cast(params["b2"], jnp.float32).reshape(1, hidden_dim)
    b3 = _cast(params["b3"], jnp.float32).reshape(1, action_dim)

    # Lane-dense output packing: `pack` batch rows per 128-lane output row.
    pack = 1
    if action_dim < 128 and 128 % action_dim == 0 and _lane_pack_supported():
        pack = min(128 // action_dim, 8)

    row_align = 8 * pack
    tile, n_steps, b_pad = _choose_tiling(B, row_align, max_batch_tile,
                                          min_grid_steps)
    if b_pad != B:
        x = jnp.pad(x, ((0, b_pad - B), (0, 0)))

    out_rows, out_cols = b_pad // pack, pack * action_dim

    in_specs = [
        pl.BlockSpec((tile, state_dim), lambda i: (i, 0)),
        pl.BlockSpec((state_dim, hidden_dim), lambda i: (0, 0)),
        pl.BlockSpec((1, hidden_dim), lambda i: (0, 0)),
        pl.BlockSpec((hidden_dim, hidden_dim), lambda i: (0, 0)),
        pl.BlockSpec((1, hidden_dim), lambda i: (0, 0)),
        pl.BlockSpec((hidden_dim, action_dim), lambda i: (0, 0)),
        pl.BlockSpec((1, action_dim), lambda i: (0, 0)),
    ]
    out_specs = pl.BlockSpec((tile // pack, out_cols), lambda i: (i, 0))

    w_itemsize = jnp.dtype(compute_dtype).itemsize
    flops = 2 * b_pad * (state_dim * hidden_dim + hidden_dim * hidden_dim
                         + hidden_dim * action_dim)
    bytes_accessed = (
        b_pad * state_dim * 4                                          # x (f32)
        + (state_dim * hidden_dim + hidden_dim * hidden_dim
           + hidden_dim * action_dim) * w_itemsize                     # weights
        + (2 * hidden_dim + action_dim) * 4                            # biases
        + b_pad * action_dim * 4)                                      # probs out

    out = pl.pallas_call(
        policy_net_kernel,
        out_shape=jax.ShapeDtypeStruct((out_rows, out_cols), jnp.float32),
        grid_spec=pltpu.PrefetchScalarGridSpec(
            num_scalar_prefetch=0,
            grid=(n_steps,),
            in_specs=in_specs,
            out_specs=out_specs,
        ),
        compiler_params=pltpu.CompilerParams(
            dimension_semantics=("parallel",),
            vmem_limit_bytes=48 * 1024 * 1024),
        cost_estimate=pl.CostEstimate(
            flops=flops,
            bytes_accessed=bytes_accessed,
            transcendentals=b_pad * action_dim),
    )(x, w1, b1, w2, b2, w3, b3)

    out = out.reshape(b_pad, action_dim)   # free row-major unpack of the slab
    return out[:B] if b_pad != B else out


def reference_forward(x, p):
    h1 = jnp.maximum(x @ p["w1"] + p["b1"], 0.0)
    h2 = jnp.maximum(h1 @ p["w2"] + p["b2"], 0.0)
    logits = h2 @ p["w3"] + p["b3"]
    return jax.nn.softmax(logits, axis=1)


if __name__ == "__main__":
    # Shapes consistent with PolicyNet(state_dim, hidden_dim=64, action_dim);
    # the Combat env dims are taken as fixed constants here.
    state_dim = 32
    hidden_dim = 64
    action_dim = 16

    key = jax.random.PRNGKey(0)
    k_x, k_p, k_x2 = jax.random.split(key, 3)
    params_f32 = init_params(k_p, state_dim, hidden_dim, action_dim)
    params = prepare_params(params_f32)          # one-time bf16 weight cast

    # --- small batch (single grid step, whole batch in one tile) ---
    batch = 8
    x = jax.random.normal(k_x, (batch, state_dim), jnp.float32)
    out = jax.block_until_ready(policy_net_forward(x, params))
    ref = reference_forward(x, params_f32)
    assert out.shape == (batch, action_dim)
    assert jnp.allclose(out, ref, atol=2e-2, rtol=2e-2)            # bf16 matmuls
    assert jnp.allclose(jnp.sum(out, axis=1), jnp.ones((batch,)), atol=1e-4)

    # f32 compute path (tighter check; only MXU pass ordering differs)
    out_f32 = jax.block_until_ready(
        policy_net_forward(x, params_f32, compute_dtype=jnp.float32))
    assert jnp.allclose(out_f32, ref, atol=5e-3, rtol=5e-3)

    # --- ragged batch: tail-aware 2-step tiling (pads 600 -> 640, not 1024) ---
    batch2 = 600
    x2 = jax.random.normal(k_x2, (batch2, state_dim), jnp.float32)
    out2 = jax.block_until_ready(policy_net_forward(x2, params))
    ref2 = reference_forward(x2, params_f32)
    assert out2.shape == (batch2, action_dim)
    assert jnp.allclose(out2, ref2, atol=2e-2, rtol=2e-2)
    assert jnp.allclose(jnp.sum(out2, axis=1), jnp.ones((batch2,)), atol=1e-4)

    print("KERNEL_OK")
</pallas_src>

<mosaic_0001>
module attributes {stable_mosaic.version = 11 : i64} {
  func.func @probe(%arg0: memref<64x16xf32, #tpu.memory_space<vmem>>, %arg1: memref<8x128xf32, #tpu.memory_space<vmem>>) attributes {dimension_semantics = [], scalar_prefetch = 0 : i64, scratch_operands = 0 : i64, tpu.core_type = #tpu.core_type<tc>} {
    %c0 = arith.constant 0 : index
    %c0_0 = arith.constant 0 : index
    %0 = vector.load %arg0[%c0, %c0_0] : memref<64x16xf32, #tpu.memory_space<vmem>>, vector<64x16xf32>
    %1 = math.exp %0 : vector<64x16xf32>
    %cst = arith.constant dense<0.000000e+00> : vector<64xf32>
    %2 = vector.multi_reduction <add>, %1, %cst [1] : vector<64x16xf32> to vector<64xf32>
    %3 = vector.shape_cast %2 : vector<64xf32> to vector<64x1xf32>
    %4 = vector.broadcast %3 : vector<64x1xf32> to vector<64x16xf32>
    %5 = arith.divf %1, %4 : vector<64x16xf32>
    %6 = vector.shape_cast %5 : vector<64x16xf32> to vector<8x128xf32>
    %c0_1 = arith.constant 0 : index
    %c0_2 = arith.constant 0 : index
    %7 = vector.load %arg1[%c0_1, %c0_2] : memref<8x128xf32, #tpu.memory_space<vmem>>, vector<8x128xf32>
    tpu.vector_store %arg1[%c0_1, %c0_2], %6 {strides = array<i32>} : memref<8x128xf32, #tpu.memory_space<vmem>>, vector<8x128xf32>,
    return
  }
}

module attributes {stable_mosaic.version = 11 : i64} {
  func.func @policy_net_kernel(%arg0: i32, %arg1: memref<8x32xf32, #tpu.memory_space<vmem>>, %arg2: memref<32x64xbf16, #tpu.memory_space<vmem>>, %arg3: memref<1x64xf32, #tpu.memory_space<vmem>>, %arg4: memref<64x64xbf16, #tpu.memory_space<vmem>>, %arg5: memref<1x64xf32, #tpu.memory_space<vmem>>, %arg6: memref<64x16xbf16, #tpu.memory_space<vmem>>, %arg7: memref<1x16xf32, #tpu.memory_space<vmem>>, %arg8: memref<8x16xf32, #tpu.memory_space<vmem>>) attributes {dimension_semantics = [#tpu.dimension_semantics<parallel>], iteration_bounds = array<i64: 1>, scalar_prefetch = 0 : i64, scratch_operands = 0 : i64, tpu.core_type = #tpu.core_type<tc>, window_params = [{transform_indices = @transform_0, window_bounds = array<i64: 8, 32>}, {pipeline_mode = #tpu.pipeline_mode<synchronous>, transform_indices = @transform_1, window_bounds = array<i64: 32, 64>}, {pipeline_mode = #tpu.pipeline_mode<synchronous>, transform_indices = @transform_2, window_bounds = array<i64: 1, 64>}, {pipeline_mode = #tpu.pipeline_mode<synchronous>, transform_indices = @transform_3, window_bounds = array<i64: 64, 64>}, {pipeline_mode = #tpu.pipeline_mode<synchronous>, transform_indices = @transform_4, window_bounds = array<i64: 1, 64>}, {pipeline_mode = #tpu.pipeline_mode<synchronous>, transform_indices = @transform_5, window_bounds = array<i64: 64, 16>}, {pipeline_mode = #tpu.pipeline_mode<synchronous>, transform_indices = @transform_6, window_bounds = array<i64: 1, 16>}, {transform_indices = @transform_7, window_bounds = array<i64: 8, 16>}]} {
    %c0 = arith.constant 0 : index
    %c0_0 = arith.constant 0 : index
    %0 = vector.load %arg1[%c0, %c0_0] : memref<8x32xf32, #tpu.memory_space<vmem>>, vector<8x32xf32>
    %1 = arith.truncf %0 : vector<8x32xf32> to vector<8x32xbf16>
    %c0_1 = arith.constant 0 : index
    %c0_2 = arith.constant 0 : index
    %2 = vector.load %arg2[%c0_1, %c0_2] : memref<32x64xbf16, #tpu.memory_space<vmem>>, vector<32x64xbf16>
    %cst = arith.constant dense<0.000000e+00> : vector<8x64xf32>
    %3 = tpu.matmul %1, %2, %cst {dimension_numbers = #tpu.dot_dimension_numbers<[1], [0], [0], [1], [0, 0, 1, 1], [], []>} : vector<8x32xbf16>, vector<32x64xbf16>, vector<8x64xf32> -> vector<8x64xf32>
    %c0_3 = arith.constant 0 : index
    %c0_4 = arith.constant 0 : index
    %4 = vector.load %arg3[%c0_3, %c0_4] : memref<1x64xf32, #tpu.memory_space<vmem>>, vector<1x64xf32>
    %5 = vector.broadcast %4 : vector<1x64xf32> to vector<8x64xf32>
    %6 = arith.addf %3, %5 : vector<8x64xf32>
    %cst_5 = arith.constant 0.000000e+00 : f32
    %7 = vector.broadcast %cst_5 : f32 to vector<8x64xf32>
    %8 = arith.maximumf %6, %7 : vector<8x64xf32>
    %9 = arith.truncf %8 : vector<8x64xf32> to vector<8x64xbf16>
    %c0_6 = arith.constant 0 : index
    %c0_7 = arith.constant 0 : index
    %10 = vector.load %arg4[%c0_6, %c0_7] : memref<64x64xbf16, #tpu.memory_space<vmem>>, vector<64x64xbf16>
    %cst_8 = arith.constant dense<0.000000e+00> : vector<8x64xf32>
    %11 = tpu.matmul %9, %10, %cst_8 {dimension_numbers = #tpu.dot_dimension_numbers<[1], [0], [0], [1], [0, 0, 1, 1], [], []>} : vector<8x64xbf16>, vector<64x64xbf16>, vector<8x64xf32> -> vector<8x64xf32>
    %c0_9 = arith.constant 0 : index
    %c0_10 = arith.constant 0 : index
    %12 = vector.load %arg5[%c0_9, %c0_10] : memref<1x64xf32, #tpu.memory_space<vmem>>, vector<1x64xf32>
    %13 = vector.broadcast %12 : vector<1x64xf32> to vector<8x64xf32>
    %14 = arith.addf %11, %13 : vector<8x64xf32>
    %cst_11 = arith.constant 0.000000e+00 : f32
    %15 = vector.broadcast %cst_11 : f32 to vector<8x64xf32>
    %16 = arith.maximumf %14, %15 : vector<8x64xf32>
    %17 = arith.truncf %16 : vector<8x64xf32> to vector<8x64xbf16>
    %c0_12 = arith.constant 0 : index
    %c0_13 = arith.constant 0 : index
    %18 = vector.load %arg6[%c0_12, %c0_13] : memref<64x16xbf16, #tpu.memory_space<vmem>>, vector<64x16xbf16>
    %cst_14 = arith.constant dense<0.000000e+00> : vector<8x16xf32>
    %19 = tpu.matmul %17, %18, %cst_14 {dimension_numbers = #tpu.dot_dimension_numbers<[1], [0], [0], [1], [0, 0, 1, 1], [], []>} : vector<8x64xbf16>, vector<64x16xbf16>, vector<8x16xf32> -> vector<8x16xf32>
    %c0_15 = arith.constant 0 : index
    %c0_16 = arith.constant 0 : index
    %20 = vector.load %arg7[%c0_15, %c0_16] : memref<1x16xf32, #tpu.memory_space<vmem>>, vector<1x16xf32>
    %21 = vector.broadcast %20 : vector<1x16xf32> to vector<8x16xf32>
    %22 = arith.addf %19, %21 : vector<8x16xf32>
    %cst_17 = arith.constant dense<0xFF800000> : vector<8xf32>
    %23 = vector.multi_reduction <maximumf>, %22, %cst_17 [1] : vector<8x16xf32> to vector<8xf32>
    %24 = vector.shape_cast %23 : vector<8xf32> to vector<8x1xf32>
    %25 = vector.broadcast %24 : vector<8x1xf32> to vector<8x16xf32>
    %26 = arith.subf %22, %25 : vector<8x16xf32>
    %27 = math.exp %26 : vector<8x16xf32>
    %cst_18 = arith.constant dense<0.000000e+00> : vector<8xf32>
    %28 = vector.multi_reduction <add>, %27, %cst_18 [1] : vector<8x16xf32> to vector<8xf32>
    %29 = vector.shape_cast %28 : vector<8xf32> to vector<8x1xf32>
    %30 = vector.broadcast %29 : vector<8x1xf32> to vector<8x16xf32>
    %31 = arith.divf %27, %30 : vector<8x16xf32>
    %c0_19 = arith.constant 0 : index
    %c0_20 = arith.constant 0 : index
    %32 = vector.load %arg8[%c0_19, %c0_20] : memref<8x16xf32, #tpu.memory_space<vmem>>, vector<8x16xf32>
    tpu.vector_store %arg8[%c0_19, %c0_20], %31 {strides = array<i32>} : memref<8x16xf32, #tpu.memory_space<vmem>>, vector<8x16xf32>,
    return
  }
  func.func @transform_0(%arg0: i32) -> (i32, i32) {
    %c0_i32 = arith.constant 0 : i32
    %c0_i32_0 = arith.constant 0 : i32
    return %arg0, %c0_i32 : i32, i32
  }
  func.func @transform_1(%arg0: i32) -> (i32, i32) {
    %c0_i32 = arith.constant 0 : i32
    %c0_i32_0 = arith.constant 0 : i32
    %c0_i32_1 = arith.constant 0 : i32
    return %c0_i32, %c0_i32_0 : i32, i32
  }
  func.func @transform_2(%arg0: i32) -> (i32, i32) {
    %c0_i32 = arith.constant 0 : i32
    %c0_i32_0 = arith.constant 0 : i32
    %c0_i32_1 = arith.constant 0 : i32
    return %c0_i32, %c0_i32_0 : i32, i32
  }
  func.func @transform_3(%arg0: i32) -> (i32, i32) {
    %c0_i32 = arith.constant 0 : i32
    %c0_i32_0 = arith.constant 0 : i32
    %c0_i32_1 = arith.constant 0 : i32
    return %c0_i32, %c0_i32_0 : i32, i32
  }
  func.func @transform_4(%arg0: i32) -> (i32, i32) {
    %c0_i32 = arith.constant 0 : i32
    %c0_i32_0 = arith.constant 0 : i32
    %c0_i32_1 = arith.constant 0 : i32
    return %c0_i32, %c0_i32_0 : i32, i32
  }
  func.func @transform_5(%arg0: i32) -> (i32, i32) {
    %c0_i32 = arith.constant 0 : i32
    %c0_i32_0 = arith.constant 0 : i32
    %c0_i32_1 = arith.constant 0 : i32
    return %c0_i32, %c0_i32_0 : i32, i32
  }
  func.func @transform_6(%arg0: i32) -> (i32, i32) {
    %c0_i32 = arith.constant 0 : i32
    %c0_i32_0 = arith.constant 0 : i32
    %c0_i32_1 = arith.constant 0 : i32
    return %c0_i32, %c0_i32_0 : i32, i32
  }
  func.func @transform_7(%arg0: i32) -> (i32, i32) {
    %c0_i32 = arith.constant 0 : i32
    %c0_i32_0 = arith.constant 0 : i32
    return %arg0, %c0_i32 : i32, i32
  }
}

</mosaic_0001>

<bundles_post_ra>
// kernel: tpu_custom_call.1
= control target key start
LH: loop header
LB: loop body
LE: loop exit
PB: predicated region body
PF: predicated region fallthrough
CT: control target
= control target key end

     0   :  { %12 = vsyncpa [#allocation3], 0  ;;  %s548_s0 = inlined_call_operand.hbm [shape: f32[8,32], index: 0, kind: input, shape index: {}]   ;;  %s549_s1 = inlined_call_operand.vmem [shape: bf16[32,64], index: 1, kind: input, shape index: {}]   ;;  %s550_s2 = inlined_call_operand.vmem [shape: f32[1,64], index: 2, kind: input, shape index: {}]   ;;  %s551_s3 = inlined_call_operand.vmem [shape: bf16[64,64], index: 3, kind: input, shape index: {}]   ;;  %s552_s4 = inlined_call_operand.vmem [shape: f32[1,64], index: 4, kind: input, shape index: {}]   ;;  %s553_s5 = inlined_call_operand.vmem [shape: bf16[64,16], index: 5, kind: input, shape index: {}]   ;;  %s554_s6 = inlined_call_operand.vmem [shape: f32[1,16], index: 6, kind: input, shape index: {}]   ;;  %s555_s7 = inlined_call_operand.hbm [shape: f32[8,16], index: 7, kind: output, shape index: {}]  }
   0x1   :  { %13 = vsyncpa [#allocation4], 0  ;;  %s433_s24 = smov [#allocation2]   ;;  %s385_s28 = scalar_lea.hbm %s548_s0, 128 }
   0x2   :  { %s20_s25 = sshll.u32 %s433_s24, 4  ;;  %p386_p0 = scmp.ne.s32.totalorder %s548_s0, %s385_s28  ;;  %s21_s25 = int_to_ptr.vmem [resolvable:$true] %s20_s25 }
   0x3   :  { %p389_p1 = scmp.lt.u32.totalorder %s385_s28, %s548_s0 }
   0x5   :  { %p391_p2 = pnand %p389_p1, %p386_p0 }
   0x7   :  { %394 = shalt.err (!%p391_p2)
}
   0x8   :  { %s395_s10 = scalar_lea.vmem %s21_s25, 128  ;;  %p400_p4 = scmp.lt.s32.totalorder %s21_s25, %s21_s25 }
   0x9   :  { %p396_p3 = scmp.ne.s32.totalorder %s21_s25, %s395_s10  ;;  %p401_p5 = scmp.lt.s32.totalorder %s395_s10, %s395_s10 }
   0xb   :  { %p402_p6 = por %p401_p5, %p400_p4 }
   0xd   :  { %p403_p7 = pnand %p402_p6, %p396_p3 }
   0xf   :  { %406 = shalt.err (!%p403_p7)
}
  0x10   :  { %23 = dma.hbm_to_vmem [thread:$0]  %s548_s0, 128, %s21_s25, [#allocation3]  }
  0x11   :  { %429 = dma.done.wait [#allocation3], 128  }
  0x12   :  { %430 = vsyncadd [#allocation3], 4294967168  ;;  %v434_v0 = vmov 0.0   ;;  %vm435_vm0 = vmmov 0   ;;  %v371_v1 = vld [vmem:[%s549_s1] sm:$0xff]   ;;  %v372_v2 = vld [vmem:[%s549_s1 + $0x8] sm:$0xff]  }
  0x13   :  { %335 = vmatprep.subr.bf16.mxu0 %v434_v0  ;;  %339 = vmatprep.mubr.msk.bf16.mxu0 %vm435_vm0, %v434_v0  ;;  %v40_v3 = vld [vmem:[#allocation2] sm:$0xff]  ;;  %vm65_vm1 = vcmask 261120   ;;  %v374_v5 = vld [vmem:[%s551_s3 + $0x8] sm:$0xff]   ;;  %v375_v7 = vld [vmem:[%s551_s3 + $0x10] sm:$0xff]   ;;  %vm150_vm2 = vcmask 523264   ;;  %vm278_vm3 = vcmask 130048  }
  0x14   :  { %343 = vmatprep.subr.bf16.mxu1 %v434_v0  ;;  %351 = vmatprep.mubr.msk.bf16.mxu1 %vm435_vm0, %v434_v0  ;;  %v373_v4 = vld [vmem:[%s551_s3] sm:$0xff]   ;;  %v41_v6 = vpack.c.bf16 %v40_v3, %v40_v3  ;;  %v376_v8 = vld [vmem:[%s551_s3 + $0x18] sm:$0xff]   ;;  %v378_v10 = vld [vmem:[%s553_s5 + $0x8] sm:$0xff]  }
  0x15   :  { %336 = vmatpush3.bf16.msra.mxu0 %v371_v1  ;;  %344 = vmatpush3.bf16.msra.mxu1 %v373_v4  ;;  %v377_v9 = vld [vmem:[%s553_s5] sm:$0xff]   ;;  %v379_v19 = vld [vmem:[%s553_s5 + $0x10] sm:$0xff]   ;;  %v380_v20 = vld [vmem:[%s553_s5 + $0x18] sm:$0xff]  }
  0x16   :  { %337 = vmatprep.subr.bf16.mxu0 %v434_v0  ;;  %345 = vmatprep.subr.bf16.mxu1 %v434_v0  ;;  %v306_v11 = vld [vmem:[%s550_s2] ss:$0 sm:$0xff] }
  0x17   :  { %v310_v21 = vld [vmem:[%s552_s4] ss:$0 sm:$0xff]  ;;  %s436_s4 = smov [#allocation5]  }
  0x18   :  { %v316_v29 = vld [vmem:[%s554_s6] ss:$0 sm:$0xff]  ;;  %s297_s5 = sshll.u32 %s436_s4, 4  ;;  %s298_s5 = int_to_ptr.vmem [resolvable:$true] %s297_s5 }
  0x19   :  { %338 = vmatpush3.bf16.msra.mxu0 %v372_v2  ;;  %346 = vmatpush3.bf16.msra.mxu1 %v374_v5  ;;  %s407_s6 = scalar_lea.vmem %s298_s5, 128  ;;  %p412_p9 = scmp.lt.s32.totalorder %s298_s5, %s298_s5 }
  0x1a   :  { %355 = vmatprep.subr.bf16.mxu0 %v434_v0  ;;  %347 = vmatprep.subr.bf16.mxu1 %v434_v0  ;;  %p408_p8 = scmp.ne.s32.totalorder %s298_s5, %s407_s6  ;;  %p413_p10 = scmp.lt.s32.totalorder %s407_s6, %s407_s6 }
  0x1c   :  { %340 = vmatmul.mubr.msk.bf16.vlgmr.msra.gmra.mrb[0].mxu0 %vm65_vm1, %v41_v6  ;;  %p414_p11 = por %p413_p10, %p412_p9 }
  0x1d   :  { %363 = vmatprep.mubr.msk.bf16.mxu0 %vm435_vm0, %v434_v0  ;;  %348 = vmatpush3.bf16.msra.mxu1 %v375_v7 }
  0x1e   :  { %349 = vmatprep.subr.bf16.mxu1 %v434_v0  ;;  %356 = vmatpush3.bf16.msra.mxu0 %v377_v9  ;;  %p415_p12 = pnand %p414_p11, %p408_p8 }
  0x1f   :  { %357 = vmatprep.subr.bf16.mxu0 %v434_v0 }
  0x21   :  { %350 = vmatpush3.bf16.msra.mxu1 %v376_v8 }
  0x22   :  { %358 = vmatpush3.bf16.msra.mxu0 %v378_v10 }
  0x23   :  { %359 = vmatprep.subr.bf16.mxu0 %v434_v0 }
  0x26   :  { %360 = vmatpush3.bf16.msra.mxu0 %v379_v19 }
  0x27   :  { %361 = vmatprep.subr.bf16.mxu0 %v434_v0 }
  0x2a   :  { %362 = vmatpush3.bf16.msra.mxu0 %v380_v20 }
  0xef   :  { %v103_v12 = vpop.f32.mrb[0].mxu0 }
  0xf0   :  { %v104_v13 = vadd.f32 %v306_v11, %v103_v12  ;;  %v341_v14 = vpop.f32.mrb[1].mxu0 }
  0xf1   :  { %v106_v15 = vpop.f32.mrb[2].mxu0 }
  0xf2   :  { %v109_v16 = vmax.f32 %v104_v13, 0.0  ;;  %v342_v17 = vpop.f32.mrb[3].mxu0 }
  0xf4   :  { %v110_v18 = vpack.c.bf16 %v109_v16, %v109_v16 }
  0xf6   :  { %352 = vmatmul.mubr.msk.bf16.vlgmr.msra.gmra.mrb[0].mxu1 %vm150_vm2, %v110_v18 }
 0x1c9   :  { %v188_v22 = vpop.f32.mrb[0].mxu1 }
 0x1ca   :  { %v189_v23 = vadd.f32 %v310_v21, %v188_v22  ;;  %v353_v24 = vpop.f32.mrb[1].mxu1 }
 0x1cb   :  { %v191_v25 = vpop.f32.mrb[2].mxu1 }
 0x1cc   :  { %v194_v26 = vmax.f32 %v189_v23, 0.0  ;;  %v354_v27 = vpop.f32.mrb[3].mxu1 }
 0x1ce   :  { %v195_v28 = vpack.c.bf16 %v194_v26, %v194_v26 }
 0x1d0   :  { %364 = vmatmul.mubr.msk.bf16.vlgmr.msra.gmra.mrb[4].mxu0 %vm150_vm2, %v195_v28 }
 0x2a3   :  { %v272_v30 = vpop.f32.mrb[4].mxu0 }
 0x2a4   :  { %v273_v31 = vadd.f32 %v316_v29, %v272_v30  ;;  %v365_v32 = vpop.f32.mrb[5].mxu0 }
 0x2a5   :  { %v275_v33 = vpop.f32.mrb[6].mxu0 }
 0x2a6   :  { %v366_v34 = vpop.f32.mrb[7].mxu0  ;;  %v279_v35 = vsel %vm278_vm3, %v273_v31, -inf }
 0x2a7   :  { %280 = vmax.xlane.f32.xlu0 %v279_v35 }
 0x334   :  { %v281_v36 = vpop.xlane.xlu0 %280 }
 0x335   :  { %v282_v37 = vsub.f32 %v273_v31, %v281_v36 }
 0x337   :  { %v283_v38 = vmul.f32 1.442695, %v282_v37 }
 0x339   :  { %381 = vpow2.f32 %v283_v38 }
 0x343   :  { %v382_v39 = vpop.eup %381 }
 0x344   :  { %v285_v40 = vsel %vm278_vm3, %v382_v39, 0.0 }
 0x345   :  { %286 = vadd.xlane.f32.xlu0 %v285_v40 }
 0x3d2   :  { %v287_v41 = vpop.xlane.xlu0 %286 }
 0x3d3   :  { %383 = vrcp.f32 %v287_v41 }
 0x3dd   :  { %v384_v42 = vpop.eup %383 }
 0x3de   :  { %v289_v43 = vmul.f32 %v384_v42, %v382_v39 }
 0x3e0   :  { %290 = vst.msk [vmem:[#allocation5] sm:$0xff] %vm278_vm3, %v289_v43 }
 0x3e1   :  { %418 = shalt.err (!%p415_p12)
}
 0x3e2   :  { %s419_s14 = scalar_lea.hbm %s555_s7, 128 }
 0x3e3   :  { %p420_p13 = scmp.ne.s32.totalorder %s555_s7, %s419_s14  ;;  %p423_p0 = scmp.lt.u32.totalorder %s419_s14, %s555_s7 }
 0x3e5   :  { %p425_p1 = pnand %p423_p0, %p420_p13 }
 0x3e7   :  { %428 = shalt.err (!%p425_p1)
}
 0x3e8   :  { %300 = dma.vmem_to_hbm [thread:$0]  %s298_s5, 128, %s555_s7, [#allocation4]  }
 0x3e9   :  { %431 = dma.done.wait [#allocation4], 128  }
 0x3ea   :  { %432 = vsyncadd [#allocation4], 4294967168 }
 0x3eb   :  { %304 = vsyncpa [#allocation3], 1 }
 0x3ec   :  { %305 = vsyncpa [#allocation4], 1 }

</bundles_post_ra>
